<compile_context>
chip_gen: v6e
topology: v6e:2x2x1
jax: 0.10.0
libtpu: 0.0.40
codegen_flags: <defaults>
</compile_context>

<pallas_src>
import functools
import math

import numpy as np

import jax
import jax.numpy as jnp
from jax.experimental import pallas as pl
from jax.experimental.pallas import tpu as pltpu

_MIB = 1024 * 1024


def _round_up(x, m):
    return ((x + m - 1) // m) * m


def _cdiv(a, b):
    return (a + b - 1) // b


def _vmem_capacity_bytes():
    """Per-core VMEM capacity; conservative 64 MiB (v7x) if the query fails."""
    try:
        cap = int(pltpu.get_tpu_info().vmem_capacity_bytes)
        if cap > 0:
            return cap
    except Exception:
        pass
    return 64 * _MIB


def _pick_tile(dim, cap):
    """Largest multiple of 128 that divides `dim` (itself a multiple of 128),
    no larger than `cap`."""
    best, t = 128, 128
    while t <= min(dim, cap):
        if dim % t == 0:
            best = t
        t += 128
    return best


# ---------------------------------------------------------------------------
# Kernels
# ---------------------------------------------------------------------------
def _ffn_fused_kernel(x_ref, *refs, num_layers, compute_dtype):
    """One grid step pushes a (TM, D0) token tile through the whole stack.
    refs = [w0, b0, w1, b1, ..., out]."""
    o_ref = refs[-1]
    wb = refs[:-1]

    h = x_ref[...]
    if h.dtype != compute_dtype:
        h = h.astype(compute_dtype)
    for i in range(num_layers):
        w = wb[2 * i][...]                 # (Kp, Np) compute_dtype, VMEM-resident
        b = wb[2 * i + 1][...]             # (1, Np) f32
        # MXU matmul with f32 accumulation; bias + ReLU epilogue stays f32
        # (required on v5e: no bf16 VPU), then inter-layer activation is cast
        # down to compute_dtype to halve its vreg/VMEM/vld footprint.
        y = jnp.dot(h, w, preferred_element_type=jnp.float32) + b
        if i < num_layers - 1:
            h = jnp.maximum(y, 0.0).astype(compute_dtype)
        else:
            h = y
    o_ref[...] = h.astype(o_ref.dtype)


def _linear_kernel(x_ref, w_ref, b_ref, o_ref, acc_ref, *, apply_relu):
    """K-tiled (weight-streaming) single-layer matmul + bias (+ReLU)."""
    @pl.when(pl.program_id(2) == 0)
    def _():
        acc_ref[...] = jnp.zeros_like(acc_ref)

    acc_ref[...] += jnp.dot(x_ref[...], w_ref[...],
                            preferred_element_type=jnp.float32)

    @pl.when(pl.program_id(2) == pl.num_programs(2) - 1)
    def _():
        y = acc_ref[...] + b_ref[...]
        if apply_relu:
            y = jnp.maximum(y, 0.0)
        o_ref[...] = y.astype(o_ref.dtype)


# ---------------------------------------------------------------------------
# Pure-JAX reference (identical math)
# ---------------------------------------------------------------------------
def _ffn_forward_jnp(params, x):
    n = len(params)
    for i, (w, b) in enumerate(params):
        x = x @ w + b.reshape(-1)
        if i < n - 1:
            x = jax.nn.relu(x)
    return x


# ---------------------------------------------------------------------------
# Parameter preparation (pad/cast ONCE; cacheable by the caller)
# ---------------------------------------------------------------------------
def prepare_ffn_params(params, compute_dtype=jnp.bfloat16):
    """Zero-pad feature dims to multiples of 128 and cast weights to
    compute_dtype.  Returns (prepared, dims, pdims); cache and reuse across
    forward calls to avoid a full HBM read+write of the weights per call."""
    compute_dtype = np.dtype(compute_dtype)
    dims = [params[0][0].shape[0]] + [w.shape[1] for (w, _) in params]
    pdims = [_round_up(d, 128) for d in dims]
    prepared = []
    for li, (w, b) in enumerate(params):
        K, N = w.shape
        Kp, Np = pdims[li], pdims[li + 1]
        wp = w.astype(compute_dtype)
        if (Kp, Np) != (K, N):
            wp = jnp.zeros((Kp, Np), compute_dtype).at[:K, :N].set(wp)
        bp = b.reshape(1, N).astype(jnp.float32)
        if Np != N:
            bp = jnp.zeros((1, Np), jnp.float32).at[:, :N].set(bp)
        prepared.append((wp, bp))
    return prepared, tuple(dims), tuple(pdims)


# ---------------------------------------------------------------------------
# Fused-path launcher
# ---------------------------------------------------------------------------
def _run_fused(xp, prepared, TM, out_pdim, out_dtype, compute_dtype,
               cost, vmem_limit, single_buffer):
    Mp, D0 = xp.shape
    num_layers = len(prepared)

    in_specs = [pl.BlockSpec((TM, D0), lambda i: (i, 0))]
    flat = [xp]
    for (wp, bp) in prepared:
        Kp, Np = wp.shape
        if single_buffer:
            # Constant block index -> fetched once; single-buffering halves
            # its resident VMEM (doubles the layer width that stays fused).
            w_spec = pl.BlockSpec((Kp, Np), lambda i: (0, 0),
                                  pipeline_mode=pl.Buffered(1))
            b_spec = pl.BlockSpec((1, Np), lambda i: (0, 0),
                                  pipeline_mode=pl.Buffered(1))
        else:
            w_spec = pl.BlockSpec((Kp, Np), lambda i: (0, 0))
            b_spec = pl.BlockSpec((1, Np), lambda i: (0, 0))
        in_specs += [w_spec, b_spec]
        flat += [wp, bp]

    kernel = functools.partial(_ffn_fused_kernel, num_layers=num_layers,
                               compute_dtype=compute_dtype)
    return pl.pallas_call(
        kernel,
        out_shape=jax.ShapeDtypeStruct((Mp, out_pdim), out_dtype),
        grid=(Mp // TM,),
        in_specs=in_specs,
        out_specs=pl.BlockSpec((TM, out_pdim), lambda i: (i, 0)),
        compiler_params=pltpu.CompilerParams(
            dimension_semantics=("parallel",),
            vmem_limit_bytes=int(vmem_limit)),
        cost_estimate=cost,
    )(*flat)


# ---------------------------------------------------------------------------
# Weight-streaming fallback (per-layer, K/N-tiled, f32 VMEM accumulator)
# ---------------------------------------------------------------------------
def _run_layered(xp, prepared, TM, out_dtype, compute_dtype, vmem_cap):
    Mp = xp.shape[0]
    num_layers = len(prepared)
    h = xp
    for li, (wp, bp) in enumerate(prepared):
        Kp, Np = wp.shape
        last = li == num_layers - 1
        o_dtype = out_dtype if last else compute_dtype
        TN = _pick_tile(Np, 512)
        TK = _pick_tile(Kp, 512)

        in_b = np.dtype(h.dtype).itemsize
        w_b = np.dtype(wp.dtype).itemsize
        o_b = np.dtype(o_dtype).itemsize
        vmem_est = (2 * TM * TK * in_b + 2 * TK * TN * w_b + 2 * TN * 4
                    + 2 * TM * TN * o_b + TM * TN * 4)
        vmem_limit = int(min(vmem_cap, max(vmem_est + 16 * _MIB, 32 * _MIB)))
        cost = pl.CostEstimate(
            flops=2 * Mp * Kp * Np, transcendentals=0,
            bytes_accessed=int(Mp * Kp * in_b + Kp * Np * w_b
                               + Np * 4 + Mp * Np * o_b))

        kernel = functools.partial(_linear_kernel, apply_relu=not last)
        h = pl.pallas_call(
            kernel,
            out_shape=jax.ShapeDtypeStruct((Mp, Np), o_dtype),
            grid=(Mp // TM, Np // TN, Kp // TK),
            in_specs=[pl.BlockSpec((TM, TK), lambda i, j, k: (i, k)),
                      pl.BlockSpec((TK, TN), lambda i, j, k: (k, j)),
                      pl.BlockSpec((1, TN), lambda i, j, k: (0, j))],
            out_specs=pl.BlockSpec((TM, TN), lambda i, j, k: (i, j)),
            scratch_shapes=[pltpu.VMEM((TM, TN), jnp.float32)],
            compiler_params=pltpu.CompilerParams(
                dimension_semantics=("parallel", "parallel", "arbitrary"),
                vmem_limit_bytes=vmem_limit),
            cost_estimate=cost,
        )(h, wp, bp)
    return h


# ---------------------------------------------------------------------------
# Public entry points
# ---------------------------------------------------------------------------
def ffn_forward_pallas(params, x, *, compute_dtype=jnp.bfloat16, tm=None,
                       prepared=None, vmem_budget_bytes=None):
    """FFN forward via Pallas.

    params: list of (w, b), w: (in_dim, out_dim) [= PyTorch weight.T],
            b: (1, out_dim).
    x: (..., input_dim).  Output keeps x.dtype.
    prepared: optional cached result of prepare_ffn_params(params, compute_dtype).
    """
    compute_dtype = np.dtype(compute_dtype)
    orig_shape = x.shape
    in_dim = orig_shape[-1]
    x2d = x.reshape(-1, in_dim)
    M = x2d.shape[0]
    num_layers = len(params)
    assert num_layers >= 1 and params[0][0].shape[0] == in_dim

    if prepared is None:
        prepared, dims, pdims = prepare_ffn_params(params, compute_dtype)
    else:
        prepared, dims, pdims = prepared
        assert np.dtype(prepared[0][0].dtype) == compute_dtype, \
            "prepared params dtype must match compute_dtype"
    out_dim, out_pdim = dims[-1], pdims[-1]
    out_dtype = np.dtype(x.dtype)

    vmem_cap = _vmem_capacity_bytes()
    budget = (int(vmem_budget_bytes) if vmem_budget_bytes is not None
              else int(0.7 * vmem_cap))

    # Per-generation token-tile default: fat tiles on 128 MiB parts (v5e/v6e),
    # 256 on v7x to keep weights resident within 64 MiB per core.
    if tm is None:
        tm = 256 if vmem_cap <= 64 * _MIB else 512

    # Input streamed in compute_dtype (halves per-tile DMA bytes for bf16).
    # TODO(synk): optional fp8 weight path for v7x (keep x/activations bf16).
    x_store_dtype = compute_dtype
    all32 = (np.dtype(x_store_dtype).itemsize == 4
             and out_dtype.itemsize == 4 and compute_dtype.itemsize == 4)
    mult = 8 if all32 else 16                      # sublane multiple (f32 / 16-bit)

    TM = min(_round_up(M, mult), _round_up(tm, mult))
    # On v7x (2 TensorCores), prefer >= 2 token tiles when M allows.
    if vmem_cap <= 64 * _MIB and _round_up(M, TM) // TM == 1 and M >= 128:
        TM = _round_up(_cdiv(M, 2), mult)
    Mp = _round_up(M, TM)

    # Pad/cast the activations only when actually needed.
    need_pad = (Mp != M) or (pdims[0] != in_dim) or (x2d.dtype != x_store_dtype)
    if need_pad:
        xp = jnp.zeros((Mp, pdims[0]), x_store_dtype).at[:M, :in_dim].set(
            x2d.astype(x_store_dtype))
    else:
        xp = x2d

    # VMEM estimate for the fused path: double-buffered x/out tiles,
    # single-buffered resident weights/biases, plus the live intermediate
    # activation tiles (f32 epilogue + compute_dtype copy).
    wbytes = compute_dtype.itemsize
    xbytes = np.dtype(x_store_dtype).itemsize
    obytes = out_dtype.itemsize
    max_pd = max(pdims)
    weight_bytes = sum(pdims[i] * pdims[i + 1] * wbytes + pdims[i + 1] * 4
                       for i in range(num_layers))
    vmem_est = (2 * TM * pdims[0] * xbytes
                + 2 * TM * out_pdim * obytes
                + weight_bytes
                + TM * max_pd * (4 + wbytes))

    if vmem_est <= budget:
        vmem_limit = min(vmem_cap, max(vmem_est + 16 * _MIB, 32 * _MIB))
        cost = pl.CostEstimate(
            flops=2 * Mp * sum(pdims[i] * pdims[i + 1]
                               for i in range(num_layers)),
            transcendentals=0,
            bytes_accessed=int(Mp * pdims[0] * xbytes + weight_bytes
                               + Mp * out_pdim * obytes))
        if hasattr(pl, "Buffered"):
            try:
                out = _run_fused(xp, prepared, TM, out_pdim, out_dtype,
                                 compute_dtype, cost, vmem_limit,
                                 single_buffer=True)
            except Exception:
                # Older/odd jax builds: retry with default double buffering.
                out = _run_fused(xp, prepared, TM, out_pdim, out_dtype,
                                 compute_dtype, cost, vmem_limit,
                                 single_buffer=False)
        else:
            out = _run_fused(xp, prepared, TM, out_pdim, out_dtype,
                             compute_dtype, cost, vmem_limit,
                             single_buffer=False)
    else:
        # Weights don't fit VMEM-resident (common on v7x's 64 MiB): stream
        # weight slabs through a per-layer K/N-tiled Pallas matmul instead of
        # dropping to plain XLA.
        out = _run_layered(xp, prepared, TM, out_dtype, compute_dtype, vmem_cap)

    out = out[:M, :out_dim]
    return out.reshape(*orig_shape[:-1], out_dim)


def ffn_forward(params, x, *, force_pallas=False, compute_dtype=jnp.bfloat16,
                tm=None, prepared=None):
    """Gated entry point: tiny problems are pure launch/DMA overhead in
    Pallas, so they route to plain XLA unless forced."""
    tokens = math.prod(x.shape[:-1])
    macs = tokens * sum(w.shape[0] * w.shape[1] for (w, _) in params)
    if not force_pallas and macs < (1 << 22):
        return _ffn_forward_jnp(params, x)
    return ffn_forward_pallas(params, x, compute_dtype=compute_dtype, tm=tm,
                              prepared=prepared)


def init_ffn_params(key, input_dim, hidden_dim, output_dim, num_layers):
    """Matches PyTorch nn.Linear default init U(-1/sqrt(in), 1/sqrt(in))."""
    h = [hidden_dim] * (num_layers - 1)
    dims_in = [input_dim] + h
    dims_out = h + [output_dim]
    params = []
    for n_in, n_out in zip(dims_in, dims_out):
        key, kw, kb = jax.random.split(key, 3)
        bound = 1.0 / math.sqrt(n_in)
        w = jax.random.uniform(kw, (n_in, n_out), jnp.float32, -bound, bound)
        b = jax.random.uniform(kb, (1, n_out), jnp.float32, -bound, bound)
        params.append((w, b))
    return params


if __name__ == "__main__":
    key = jax.random.PRNGKey(0)
    input_dim, hidden_dim, output_dim, num_layers = 16, 32, 8, 3

    kp, kx = jax.random.split(key)
    params = init_ffn_params(kp, input_dim, hidden_dim, output_dim, num_layers)

    # x: (batch=2, seq=8, input_dim=16) — nn.Linear applies to the last dim.
    x = jax.random.normal(kx, (2, 8, input_dim), jnp.float32)

    ref = _ffn_forward_jnp(params, x)

    # Fused f32 path, tm=8 -> 2 token tiles (exercises M-tiling and constant
    # weight index_map / single-buffered residency across grid steps).
    out_f32 = jax.block_until_ready(
        ffn_forward_pallas(params, x, compute_dtype=jnp.float32, tm=8))
    assert out_f32.shape == (2, 8, output_dim), out_f32.shape
    assert jnp.allclose(out_f32, ref, atol=1e-4, rtol=1e-4), "f32 mismatch"

    # Fused bf16 path with cached (pre-padded / pre-cast) params: x streamed
    # bf16, f32 accumulation, output written directly in x.dtype.
    prepared_bf16 = prepare_ffn_params(params, jnp.bfloat16)
    out_bf16 = jax.block_until_ready(
        ffn_forward_pallas(params, x, compute_dtype=jnp.bfloat16,
                           prepared=prepared_bf16))
    assert out_bf16.shape == (2, 8, output_dim), out_bf16.shape
    assert jnp.allclose(out_bf16, ref, atol=5e-2, rtol=5e-2), "bf16 mismatch"

    # Weight-streaming fallback path (K/N-tiled per-layer kernels), forced by
    # a tiny VMEM budget to exercise the large-layer route.
    out_stream = jax.block_until_ready(
        ffn_forward_pallas(params, x, compute_dtype=jnp.float32,
                           vmem_budget_bytes=1))
    assert out_stream.shape == (2, 8, output_dim), out_stream.shape
    assert jnp.allclose(out_stream, ref, atol=1e-4, rtol=1e-4), "stream mismatch"

    # Gated entry point: this toy size routes to plain XLA (overhead gate).
    out_gated = jax.block_until_ready(ffn_forward(params, x))
    assert jnp.allclose(out_gated, ref, atol=1e-6, rtol=1e-6), "gated mismatch"

    print("KERNEL_OK")
</pallas_src>

<mosaic_0001>
module attributes {stable_mosaic.version = 11 : i64} {
  func.func @_ffn_fused_kernel(%arg0: i32, %arg1: memref<8x128xf32, #tpu.memory_space<vmem>>, %arg2: memref<128x128xf32, #tpu.memory_space<vmem>>, %arg3: memref<1x128xf32, #tpu.memory_space<vmem>>, %arg4: memref<128x128xf32, #tpu.memory_space<vmem>>, %arg5: memref<1x128xf32, #tpu.memory_space<vmem>>, %arg6: memref<128x128xf32, #tpu.memory_space<vmem>>, %arg7: memref<1x128xf32, #tpu.memory_space<vmem>>, %arg8: memref<8x128xf32, #tpu.memory_space<vmem>>) attributes {dimension_semantics = [#tpu.dimension_semantics<parallel>], iteration_bounds = array<i64: 2>, scalar_prefetch = 0 : i64, scratch_operands = 0 : i64, tpu.core_type = #tpu.core_type<tc>, window_params = [{transform_indices = @transform_0, window_bounds = array<i64: 8, 128>}, {pipeline_mode = #tpu.pipeline_mode<synchronous>, transform_indices = @transform_1, window_bounds = array<i64: 128, 128>}, {pipeline_mode = #tpu.pipeline_mode<synchronous>, transform_indices = @transform_2, window_bounds = array<i64: 1, 128>}, {pipeline_mode = #tpu.pipeline_mode<synchronous>, transform_indices = @transform_3, window_bounds = array<i64: 128, 128>}, {pipeline_mode = #tpu.pipeline_mode<synchronous>, transform_indices = @transform_4, window_bounds = array<i64: 1, 128>}, {pipeline_mode = #tpu.pipeline_mode<synchronous>, transform_indices = @transform_5, window_bounds = array<i64: 128, 128>}, {pipeline_mode = #tpu.pipeline_mode<synchronous>, transform_indices = @transform_6, window_bounds = array<i64: 1, 128>}, {transform_indices = @transform_7, window_bounds = array<i64: 8, 128>}]} {
    %c0 = arith.constant 0 : index
    %c0_0 = arith.constant 0 : index
    %0 = vector.load %arg1[%c0, %c0_0] : memref<8x128xf32, #tpu.memory_space<vmem>>, vector<8x128xf32>
    %c0_1 = arith.constant 0 : index
    %c0_2 = arith.constant 0 : index
    %1 = vector.load %arg2[%c0_1, %c0_2] : memref<128x128xf32, #tpu.memory_space<vmem>>, vector<128x128xf32>
    %c0_3 = arith.constant 0 : index
    %c0_4 = arith.constant 0 : index
    %2 = vector.load %arg3[%c0_3, %c0_4] : memref<1x128xf32, #tpu.memory_space<vmem>>, vector<1x128xf32>
    %cst = arith.constant dense<0.000000e+00> : vector<8x128xf32>
    %3 = tpu.matmul %0, %1, %cst {dimension_numbers = #tpu.dot_dimension_numbers<[1], [0], [0], [1], [0, 0, 1, 1], [], []>} : vector<8x128xf32>, vector<128x128xf32>, vector<8x128xf32> -> vector<8x128xf32>
    %4 = vector.broadcast %2 : vector<1x128xf32> to vector<8x128xf32>
    %5 = arith.addf %3, %4 : vector<8x128xf32>
    %cst_5 = arith.constant 0.000000e+00 : f32
    %6 = vector.broadcast %cst_5 : f32 to vector<8x128xf32>
    %7 = arith.maximumf %5, %6 : vector<8x128xf32>
    %c0_6 = arith.constant 0 : index
    %c0_7 = arith.constant 0 : index
    %8 = vector.load %arg4[%c0_6, %c0_7] : memref<128x128xf32, #tpu.memory_space<vmem>>, vector<128x128xf32>
    %c0_8 = arith.constant 0 : index
    %c0_9 = arith.constant 0 : index
    %9 = vector.load %arg5[%c0_8, %c0_9] : memref<1x128xf32, #tpu.memory_space<vmem>>, vector<1x128xf32>
    %cst_10 = arith.constant dense<0.000000e+00> : vector<8x128xf32>
    %10 = tpu.matmul %7, %8, %cst_10 {dimension_numbers = #tpu.dot_dimension_numbers<[1], [0], [0], [1], [0, 0, 1, 1], [], []>} : vector<8x128xf32>, vector<128x128xf32>, vector<8x128xf32> -> vector<8x128xf32>
    %11 = vector.broadcast %9 : vector<1x128xf32> to vector<8x128xf32>
    %12 = arith.addf %10, %11 : vector<8x128xf32>
    %cst_11 = arith.constant 0.000000e+00 : f32
    %13 = vector.broadcast %cst_11 : f32 to vector<8x128xf32>
    %14 = arith.maximumf %12, %13 : vector<8x128xf32>
    %c0_12 = arith.constant 0 : index
    %c0_13 = arith.constant 0 : index
    %15 = vector.load %arg6[%c0_12, %c0_13] : memref<128x128xf32, #tpu.memory_space<vmem>>, vector<128x128xf32>
    %c0_14 = arith.constant 0 : index
    %c0_15 = arith.constant 0 : index
    %16 = vector.load %arg7[%c0_14, %c0_15] : memref<1x128xf32, #tpu.memory_space<vmem>>, vector<1x128xf32>
    %cst_16 = arith.constant dense<0.000000e+00> : vector<8x128xf32>
    %17 = tpu.matmul %14, %15, %cst_16 {dimension_numbers = #tpu.dot_dimension_numbers<[1], [0], [0], [1], [0, 0, 1, 1], [], []>} : vector<8x128xf32>, vector<128x128xf32>, vector<8x128xf32> -> vector<8x128xf32>
    %18 = vector.broadcast %16 : vector<1x128xf32> to vector<8x128xf32>
    %19 = arith.addf %17, %18 : vector<8x128xf32>
    %c0_17 = arith.constant 0 : index
    %c0_18 = arith.constant 0 : index
    %20 = vector.load %arg8[%c0_17, %c0_18] : memref<8x128xf32, #tpu.memory_space<vmem>>, vector<8x128xf32>
    tpu.vector_store %arg8[%c0_17, %c0_18], %19 {strides = array<i32>} : memref<8x128xf32, #tpu.memory_space<vmem>>, vector<8x128xf32>,
    return
  }
  func.func @transform_0(%arg0: i32) -> (i32, i32) {
    %c0_i32 = arith.constant 0 : i32
    %c0_i32_0 = arith.constant 0 : i32
    return %arg0, %c0_i32 : i32, i32
  }
  func.func @transform_1(%arg0: i32) -> (i32, i32) {
    %c0_i32 = arith.constant 0 : i32
    %c0_i32_0 = arith.constant 0 : i32
    %c0_i32_1 = arith.constant 0 : i32
    return %c0_i32, %c0_i32_0 : i32, i32
  }
  func.func @transform_2(%arg0: i32) -> (i32, i32) {
    %c0_i32 = arith.constant 0 : i32
    %c0_i32_0 = arith.constant 0 : i32
    %c0_i32_1 = arith.constant 0 : i32
    return %c0_i32, %c0_i32_0 : i32, i32
  }
  func.func @transform_3(%arg0: i32) -> (i32, i32) {
    %c0_i32 = arith.constant 0 : i32
    %c0_i32_0 = arith.constant 0 : i32
    %c0_i32_1 = arith.constant 0 : i32
    return %c0_i32, %c0_i32_0 : i32, i32
  }
  func.func @transform_4(%arg0: i32) -> (i32, i32) {
    %c0_i32 = arith.constant 0 : i32
    %c0_i32_0 = arith.constant 0 : i32
    %c0_i32_1 = arith.constant 0 : i32
    return %c0_i32, %c0_i32_0 : i32, i32
  }
  func.func @transform_5(%arg0: i32) -> (i32, i32) {
    %c0_i32 = arith.constant 0 : i32
    %c0_i32_0 = arith.constant 0 : i32
    %c0_i32_1 = arith.constant 0 : i32
    return %c0_i32, %c0_i32_0 : i32, i32
  }
  func.func @transform_6(%arg0: i32) -> (i32, i32) {
    %c0_i32 = arith.constant 0 : i32
    %c0_i32_0 = arith.constant 0 : i32
    %c0_i32_1 = arith.constant 0 : i32
    return %c0_i32, %c0_i32_0 : i32, i32
  }
  func.func @transform_7(%arg0: i32) -> (i32, i32) {
    %c0_i32 = arith.constant 0 : i32
    %c0_i32_0 = arith.constant 0 : i32
    return %arg0, %c0_i32 : i32, i32
  }
}

module attributes {stable_mosaic.version = 11 : i64} {
  func.func @_ffn_fused_kernel(%arg0: i32, %arg1: memref<8x128xf32, #tpu.memory_space<vmem>>, %arg2: memref<128x128xf32, #tpu.memory_space<vmem>>, %arg3: memref<1x128xf32, #tpu.memory_space<vmem>>, %arg4: memref<128x128xf32, #tpu.memory_space<vmem>>, %arg5: memref<1x128xf32, #tpu.memory_space<vmem>>, %arg6: memref<128x128xf32, #tpu.memory_space<vmem>>, %arg7: memref<1x128xf32, #tpu.memory_space<vmem>>, %arg8: memref<8x128xf32, #tpu.memory_space<vmem>>) attributes {dimension_semantics = [#tpu.dimension_semantics<parallel>], iteration_bounds = array<i64: 2>, scalar_prefetch = 0 : i64, scratch_operands = 0 : i64, tpu.core_type = #tpu.core_type<tc>, window_params = [{transform_indices = @transform_0, window_bounds = array<i64: 8, 128>}, {pipeline_mode = #tpu.pipeline_mode<synchronous>, transform_indices = @transform_1, window_bounds = array<i64: 128, 128>}, {pipeline_mode = #tpu.pipeline_mode<synchronous>, transform_indices = @transform_2, window_bounds = array<i64: 1, 128>}, {pipeline_mode = #tpu.pipeline_mode<synchronous>, transform_indices = @transform_3, window_bounds = array<i64: 128, 128>}, {pipeline_mode = #tpu.pipeline_mode<synchronous>, transform_indices = @transform_4, window_bounds = array<i64: 1, 128>}, {pipeline_mode = #tpu.pipeline_mode<synchronous>, transform_indices = @transform_5, window_bounds = array<i64: 128, 128>}, {pipeline_mode = #tpu.pipeline_mode<synchronous>, transform_indices = @transform_6, window_bounds = array<i64: 1, 128>}, {transform_indices = @transform_7, window_bounds = array<i64: 8, 128>}]} {
    %c0 = arith.constant 0 : index
    %c0_0 = arith.constant 0 : index
    %0 = vector.load %arg1[%c0, %c0_0] : memref<8x128xf32, #tpu.memory_space<vmem>>, vector<8x128xf32>
    %c0_1 = arith.constant 0 : index
    %c0_2 = arith.constant 0 : index
    %1 = vector.load %arg2[%c0_1, %c0_2] : memref<128x128xf32, #tpu.memory_space<vmem>>, vector<128x128xf32>
    %c0_3 = arith.constant 0 : index
    %c0_4 = arith.constant 0 : index
    %2 = vector.load %arg3[%c0_3, %c0_4] : memref<1x128xf32, #tpu.memory_space<vmem>>, vector<1x128xf32>
    %cst = arith.constant dense<0.000000e+00> : vector<8x128xf32>
    %3 = tpu.matmul %0, %1, %cst {dimension_numbers = #tpu.dot_dimension_numbers<[1], [0], [0], [1], [0, 0, 1, 1], [], []>} : vector<8x128xf32>, vector<128x128xf32>, vector<8x128xf32> -> vector<8x128xf32>
    %4 = vector.broadcast %2 : vector<1x128xf32> to vector<8x128xf32>
    %5 = arith.addf %3, %4 : vector<8x128xf32>
    %cst_5 = arith.constant 0.000000e+00 : f32
    %6 = vector.broadcast %cst_5 : f32 to vector<8x128xf32>
    %7 = arith.maximumf %5, %6 : vector<8x128xf32>
    %c0_6 = arith.constant 0 : index
    %c0_7 = arith.constant 0 : index
    %8 = vector.load %arg4[%c0_6, %c0_7] : memref<128x128xf32, #tpu.memory_space<vmem>>, vector<128x128xf32>
    %c0_8 = arith.constant 0 : index
    %c0_9 = arith.constant 0 : index
    %9 = vector.load %arg5[%c0_8, %c0_9] : memref<1x128xf32, #tpu.memory_space<vmem>>, vector<1x128xf32>
    %cst_10 = arith.constant dense<0.000000e+00> : vector<8x128xf32>
    %10 = tpu.matmul %7, %8, %cst_10 {dimension_numbers = #tpu.dot_dimension_numbers<[1], [0], [0], [1], [0, 0, 1, 1], [], []>} : vector<8x128xf32>, vector<128x128xf32>, vector<8x128xf32> -> vector<8x128xf32>
    %11 = vector.broadcast %9 : vector<1x128xf32> to vector<8x128xf32>
    %12 = arith.addf %10, %11 : vector<8x128xf32>
    %cst_11 = arith.constant 0.000000e+00 : f32
    %13 = vector.broadcast %cst_11 : f32 to vector<8x128xf32>
    %14 = arith.maximumf %12, %13 : vector<8x128xf32>
    %c0_12 = arith.constant 0 : index
    %c0_13 = arith.constant 0 : index
    %15 = vector.load %arg6[%c0_12, %c0_13] : memref<128x128xf32, #tpu.memory_space<vmem>>, vector<128x128xf32>
    %c0_14 = arith.constant 0 : index
    %c0_15 = arith.constant 0 : index
    %16 = vector.load %arg7[%c0_14, %c0_15] : memref<1x128xf32, #tpu.memory_space<vmem>>, vector<1x128xf32>
    %cst_16 = arith.constant dense<0.000000e+00> : vector<8x128xf32>
    %17 = tpu.matmul %14, %15, %cst_16 {dimension_numbers = #tpu.dot_dimension_numbers<[1], [0], [0], [1], [0, 0, 1, 1], [], []>} : vector<8x128xf32>, vector<128x128xf32>, vector<8x128xf32> -> vector<8x128xf32>
    %18 = vector.broadcast %16 : vector<1x128xf32> to vector<8x128xf32>
    %19 = arith.addf %17, %18 : vector<8x128xf32>
    %c0_17 = arith.constant 0 : index
    %c0_18 = arith.constant 0 : index
    %20 = vector.load %arg8[%c0_17, %c0_18] : memref<8x128xf32, #tpu.memory_space<vmem>>, vector<8x128xf32>
    tpu.vector_store %arg8[%c0_17, %c0_18], %19 {strides = array<i32>} : memref<8x128xf32, #tpu.memory_space<vmem>>, vector<8x128xf32>,
    return
  }
  func.func @transform_0(%arg0: i32) -> (i32, i32) {
    %c0_i32 = arith.constant 0 : i32
    %c0_i32_0 = arith.constant 0 : i32
    return %arg0, %c0_i32 : i32, i32
  }
  func.func @transform_1(%arg0: i32) -> (i32, i32) {
    %c0_i32 = arith.constant 0 : i32
    %c0_i32_0 = arith.constant 0 : i32
    %c0_i32_1 = arith.constant 0 : i32
    return %c0_i32, %c0_i32_0 : i32, i32
  }
  func.func @transform_2(%arg0: i32) -> (i32, i32) {
    %c0_i32 = arith.constant 0 : i32
    %c0_i32_0 = arith.constant 0 : i32
    %c0_i32_1 = arith.constant 0 : i32
    return %c0_i32, %c0_i32_0 : i32, i32
  }
  func.func @transform_3(%arg0: i32) -> (i32, i32) {
    %c0_i32 = arith.constant 0 : i32
    %c0_i32_0 = arith.constant 0 : i32
    %c0_i32_1 = arith.constant 0 : i32
    return %c0_i32, %c0_i32_0 : i32, i32
  }
  func.func @transform_4(%arg0: i32) -> (i32, i32) {
    %c0_i32 = arith.constant 0 : i32
    %c0_i32_0 = arith.constant 0 : i32
    %c0_i32_1 = arith.constant 0 : i32
    return %c0_i32, %c0_i32_0 : i32, i32
  }
  func.func @transform_5(%arg0: i32) -> (i32, i32) {
    %c0_i32 = arith.constant 0 : i32
    %c0_i32_0 = arith.constant 0 : i32
    %c0_i32_1 = arith.constant 0 : i32
    return %c0_i32, %c0_i32_0 : i32, i32
  }
  func.func @transform_6(%arg0: i32) -> (i32, i32) {
    %c0_i32 = arith.constant 0 : i32
    %c0_i32_0 = arith.constant 0 : i32
    %c0_i32_1 = arith.constant 0 : i32
    return %c0_i32, %c0_i32_0 : i32, i32
  }
  func.func @transform_7(%arg0: i32) -> (i32, i32) {
    %c0_i32 = arith.constant 0 : i32
    %c0_i32_0 = arith.constant 0 : i32
    return %arg0, %c0_i32 : i32, i32
  }
}

</mosaic_0001>

<bundles_post_ra>
// kernel: tpu_custom_call.1
= control target key start
LH: loop header
LB: loop body
LE: loop exit
PB: predicated region body
PF: predicated region fallthrough
CT: control target
= control target key end

     0   :  { %s1474_s0 = inlined_call_operand.hbm [shape: f32[16,128], index: 0, kind: input, shape index: {}]   ;;  %s1475_s1 = inlined_call_operand.hbm [shape: f32[128,128], index: 1, kind: input, shape index: {}]   ;;  %s1476_s2 = inlined_call_operand.vmem [shape: f32[1,128], index: 2, kind: input, shape index: {}]   ;;  %s1477_s3 = inlined_call_operand.hbm [shape: f32[128,128], index: 3, kind: input, shape index: {}]   ;;  %s1478_s4 = inlined_call_operand.vmem [shape: f32[1,128], index: 4, kind: input, shape index: {}]   ;;  %s1479_s5 = inlined_call_operand.hbm [shape: f32[128,128], index: 5, kind: input, shape index: {}]   ;;  %s1480_s6 = inlined_call_operand.vmem [shape: f32[1,128], index: 6, kind: input, shape index: {}]   ;;  %s1481_s7 = inlined_call_operand.hbm [shape: f32[16,128], index: 7, kind: output, shape index: {}]  }
   0x1   :  { %1486 = sst [smem:[#allocation15_spill]] %s1475_s1 }
   0x2   :  { %1487 = sst [smem:[#allocation16_spill]] %s1477_s3 }
   0x3   :  { %12 = vsyncpa [#allocation3], 0 }
   0x4   :  { %14 = vsyncpa [#allocation3 + $0x1], 0 }
   0x5   :  { %15 = vsyncpa [#allocation6], 0 }
   0x6   :  { %16 = vsyncpa [#allocation9], 0 }
   0x7   :  { %17 = vsyncpa [#allocation4], 0 }
   0x8   :  { %19 = vsyncpa [#allocation4 + $0x1], 0  ;;  %s1221_s24 = smov 0   ;;  %s1223_s25 = smov 0  }
   0x9   :  { %s1225_s26 = smov 0   ;;  %s1227_s27 = smov 0  }
   0xa LB: > { %s1242_s28 = sadd.s32 4294967295, %s1170_s27   ;;  %s734_s29 = sadd.s32 4294967294, %s1170_s27   ;;  %s1170_s27 = sphi %s1227_s27, %s1509_s27   ;;  %s1166_s26 = sphi %s1225_s26, %s1508_s26   ;;  %s1162_s25 = sphi %s1223_s25, %s1507_s25   ;;  %s1158_s24 = sphi %s1221_s24, %s1506_s24  }
   0xb   : > { %p45_p0 = scmp.ne.s32.totalorder %s1162_s25, %s1158_s24  ;;  %p1482_p1 = scmp.eq.s32.totalorder %s1242_s28, 0 }
   0xc   : > { %p201_p3 = scmp.eq.s32.totalorder %s734_s29, 1  ;;  %p735_p5 = scmp.ge.s32.totalorder %s1170_s27, 1 }
   0xd   : > { %p1251_p4 = por %p1482_p1, %p45_p0  ;;  %p208_p7 = scmp.lt.s32.totalorder %s1170_s27, 3 }
   0xe   : > { %p1256_p6 = por %p201_p3, %p45_p0  ;;  %s1172_s10 = smov [#allocation5]  }
   0xf   : > { %s1488_s30 = scalar_select %p1251_p4, 1, 0 }
  0x10   : > { %s1489_s8 = scalar_select %p1256_p6, 1, 0 }
  0x11   : > { %p1261_p8 = pnand %p735_p5, %p208_p7  ;;  %s220_s11 = sshll.u32 %s1172_s10, 4  ;;  %s221_s11 = int_to_ptr.vmem [resolvable:$true] %s220_s11 }
  0x12   : > { %s1173_s13 = smov [#allocation7]   ;;  %s1174_s15 = smov [#allocation8]  }
  0x13   : > { %s1490_s9 = scalar_select %p1261_p8, 1, 0 }
  0x14   : > { %p927_p9 = pneg %p1261_p8  ;;  %s236_s14 = sshll.u32 %s1173_s13, 4  ;;  %s237_s14 = int_to_ptr.vmem [resolvable:$true] %s236_s14 }
  0x15   : > { %s252_s16 = sshll.u32 %s1174_s15, 4  ;;  %s1003_s17 = scalar_lea.vmem %s221_s11, 2048  ;;  %s253_s16 = int_to_ptr.vmem [resolvable:$true] %s252_s16 }
  0x16   : > { %p1270_p11 = pnand %p927_p9, %p1482_p1  ;;  %p1004_p13 = scmp.ne.s32.totalorder %s221_s11, %s1003_s17 }
  0x17   : > { %p1011_p5 = scmp.lt.s32.totalorder %s221_s11, %s221_s11  ;;  %p1012_p7 = scmp.lt.s32.totalorder %s1003_s17, %s1003_s17 }
  0x18   : > { %p994_p12 = pneg %p1270_p11 }
  0x19   : > { %p1013_p9 = por %p1012_p7, %p1011_p5 }
  0x1a   : > { %p1006_p0 = pnand %p1004_p13, %p994_p12 }
  0x1c   : > { %p1007_p3 = pneg %p1006_p0 }
  0x1e   : > { %p1014_p10 = pnand %p1013_p9, %p1007_p3 }
  0x20   : > { %1017 = shalt.err (!%p1014_p10)
}
  0x21   : > { %s1175_s18 = smov 128   ;;  %s1176_s19 = smov 8  }
  0x22   : > { %s1492_s1 = sld [smem:[#allocation15_spill]]  ;;  %s1029_s22 = scalar_lea.vmem %s237_s14, 2048 }
  0x23   : > { %p1030_p1 = scmp.ne.s32.totalorder %s237_s14, %s1029_s22  ;;  %p1037_p2 = scmp.lt.s32.totalorder %s237_s14, %s237_s14 }
  0x24   : > { %p1038_p6 = scmp.lt.s32.totalorder %s1029_s22, %s1029_s22 }
  0x25   : > { %p1032_p13 = pnand %p1030_p1, %p994_p12 }
  0x26   : > { %p1039_p5 = por %p1038_p6, %p1037_p2 }
  0x27   : > { %p1033_p0 = pneg %p1032_p13 }
  0x28   : > { %930 = dma.hbm_to_vmem [thread:$0]  (!%p1270_p11), %s1492_s1, 2048, %s221_s11, [#allocation6], %s1175_s18, %s1175_s18, %s1176_s19  }
  0x29   : > { %p1040_p3 = pnand %p1039_p5, %p1033_p0 }
  0x2b   : > { %1043 = shalt.err (!%p1040_p3)
}
  0x2c   : > { %s1493_s3 = sld [smem:[#allocation16_spill]]  ;;  %s1055_s10 = scalar_lea.vmem %s253_s16, 2048 }
  0x2d   : > { %p1056_p10 = scmp.ne.s32.totalorder %s253_s16, %s1055_s10  ;;  %p1063_p9 = scmp.lt.s32.totalorder %s253_s16, %s253_s16 }
  0x2e   : > { %p1064_p13 = scmp.lt.s32.totalorder %s1055_s10, %s1055_s10 }
  0x2f   : > { %p1058_p7 = pnand %p1056_p10, %p994_p12 }
  0x30   : > { %p1065_p4 = por %p1064_p13, %p1063_p9 }
  0x31   : > { %p1059_p1 = pneg %p1058_p7 }
  0x32   : > { %933 = dma.hbm_to_vmem [thread:$0]  (!%p1270_p11), %s1493_s3, 2048, %s237_s14, [#allocation6], %s1175_s18, %s1175_s18, %s1176_s19  }
  0x33   : > { %p1066_p2 = pnand %p1065_p4, %p1059_p1 }
  0x35   : > { %1069 = shalt.err (!%p1066_p2)
}
  0x36   : > { %936 = dma.hbm_to_vmem [thread:$0]  (!%p1270_p11), %s1479_s5, 2048, %s253_s16, [#allocation9], %s1175_s18, %s1175_s18, %s1176_s19  }
  0x37   : > { %s1301_s14 = sadd.s32 1, %s1170_s27   ;;  %s32_s12 = sadd.s32 1, %s1166_s26 }
  0x38   : > { %s29_s15 = ssub.s32 %s1170_s27, %s1301_s14  ;;  %p39_p6 = scmp.ne.s32.totalorder %s1166_s26, %s1162_s25 }
  0x39   : > { %p30_p4 = scmp.eq.s32.totalorder %s29_s15, 0  ;;  %p40_p12 = scmp.eq.s32.totalorder %s1170_s27, 0 }
  0x3a   : > { %p948_p0 = scmp.lt.s32.totalorder %s1170_s27, 2  ;;  %p1494_p3 = scmp.eq.s32.totalorder %s1242_s28, 1 }
  0x3b   : > { %s1311_s17 = scalar_select %p30_p4, %s1166_s26, %s32_s12  }
  0x3c   : > { %p41_p5 = por %p40_p12, %p39_p6  ;;  %p1315_p10 = por %p1494_p3, %p39_p6 }
  0x3d   : > { %s269_s21 = sand.u32 1, %s1166_s26   ;;  %s741_s22 = sshll.u32 %s1170_s27, 7 }
  0x3e   : > { %s1495_s20 = scalar_select %p1315_p10, 1, 0 }
  0x3f   : > { %s740_s16 = sshll.u32 %s269_s21, 3  ;;  %s1324_s23 = scalar_lea.hbm %s1474_s0, %s741_s22 }
  0x40   : > { %s273_s29 = scalar_lea.vmem [#allocation2], %s740_s16  ;;  %p1326_p11 = pnand %p948_p0, %p41_p5 }
  0x41   : > { %s280_s10 = sshll.u32 %s273_s29, 4  ;;  %s270_s13 = scalar_lea.sflag [#allocation3], %s269_s21  ;;  %s281_s10 = int_to_ptr.vmem [resolvable:$true] %s280_s10 }
  0x42   : > { %s1070_s15 = scalar_lea.hbm %s1324_s23, 128  ;;  %p1072_p1 = pneg %p1326_p11 }
  0x43   : > { %p1071_p7 = scmp.ne.s32.totalorder %s1324_s23, %s1070_s15  ;;  %s1075_s18 = scalar_lea.hbm %s1474_s0, 256 }
  0x44   : > { %p1076_p2 = scmp.lt.s32.totalorder %s1324_s23, %s1474_s0  ;;  %p1077_p4 = scmp.lt.s32.totalorder %s1075_s18, %s1070_s15 }
  0x45   : > { %p1073_p9 = pnand %p1072_p1, %p1071_p7 }
  0x46   : > { %p1078_p6 = por %p1077_p4, %p1076_p2 }
  0x47   : > { %p1074_p13 = pneg %p1073_p9 }
  0x49   : > { %p1079_p12 = pnand %p1078_p6, %p1074_p13 }
  0x4b   : > { %1082 = shalt.err (!%p1079_p12)
}
  0x4c   : > { %s1083_s29 = scalar_lea.vmem %s281_s10, 128  ;;  %s1177_s21 = smov [#allocation2]  }
  0x4d   : > { %p1084_p0 = scmp.ne.s32.totalorder %s281_s10, %s1083_s29  ;;  %s1088_s1 = sshll.u32 %s1177_s21, 4  ;;  %s1089_s1 = int_to_ptr.vmem [resolvable:$false] %s1088_s1 }
  0x4e   : > { %s1090_s3 = scalar_lea.vmem %s1089_s1, 256  ;;  %p1091_p7 = scmp.lt.s32.totalorder %s281_s10, %s1089_s1 }
  0x4f   : > { %p1086_p5 = pnand %p1084_p0, %p1072_p1  ;;  %p1092_p9 = scmp.lt.s32.totalorder %s1090_s3, %s1083_s29 }
  0x51   : > { %p1087_p3 = pneg %p1086_p5  ;;  %p1093_p10 = por %p1092_p9, %p1091_p7 }
  0x53   : > { %p1094_p8 = pnand %p1093_p10, %p1087_p3 }
  0x55   : > { %1097 = shalt.err (!%p1094_p8)
}
  0x56   : > { %940 = dma.hbm_to_vmem [thread:$0]  (!%p1326_p11), %s1324_s23, 128, %s281_s10, %s270_s13  }
  0x57   : > { %p1497_p13 = scmp.ne.s32.totalorder %s1490_s9, 0 }
  0x58   : > { %s1347_s15 = sand.u32 (!%p1497_p13), 1, %s1162_s25   ;;  %p1498_p8 = scmp.ne.s32.totalorder (!%p1497_p13), %s1488_s30, 0 }
  0x59   : > { %289 = sbr.rel (%p1497_p13) target bundleno = 737 (0x2e1), region = 48  ;;  %s743_s12 = sshll.u32 (!%p1497_p13), %s1347_s15, 3 }
  0x5a   : > { %s292_s1 = scalar_lea.sflag (!%p1497_p13), [#allocation3], %s1347_s15  ;;  %s1353_s3 = scalar_lea.vmem (!%p1497_p13), [#allocation2], %s743_s12 }
  0x5e   : > { %1141 = dma.done.wait (%p1498_p8), %s292_s1, 128  }
  0x5f   : > { %1143 = vsyncadd (%p1498_p8), %s292_s1, 4294967168  ;;  %p1499_p10 = scmp.eq.s32.totalorder %s1242_s28, 0 }
  0x61   : > { %1145 = dma.done.wait (%p1499_p10), [#allocation6], 4096   ;;  %p1500_p11 = pmov %p1499_p10 }
  0x62   : > { %p1501_p1 = pmov %p1499_p10 }
  0x63   : > { %1147 = vsyncadd (%p1500_p11), [#allocation6], 4294963200 }
  0x64   : > { %1149 = dma.done.wait (%p1501_p1), [#allocation9], 2048   ;;  %p1502_p2 = pmov %p1501_p1 }
  0x65   : > { %v1178_v0 = vmov 0.0   ;;  %vm1179_vm0 = vmmov 0   ;;  %v354_v1 = vld [vmem:[#allocation5 + $0x78] sm:$0xff]  ;;  %v353_v2 = vld [vmem:[#allocation5 + $0x70] sm:$0xff]  ;;  %v352_v3 = vld [vmem:[#allocation5 + $0x68] sm:$0xff]  ;;  %s752_s22 = sshll.u32 %s1242_s28, 7 }
  0x66   : > { %1151 = vsyncadd (%p1502_p2), [#allocation9], 4294965248  ;;  %806 = vmatprep.subr.mxu0 %v1178_v0  ;;  %838 = vmatprep.mubr.msk.f32.mxu0 %vm1179_vm0, %v1178_v0  ;;  %v351_v4 = vld [vmem:[#allocation5 + $0x60] sm:$0xff]  ;;  %v448_v5 = vld [vmem:[#allocation7 + $0x78] sm:$0xff]  ;;  %s337_s18 = scalar_lea.vmem [#allocation10], %s743_s12  ;;  %s1437_s21 = scalar_lea.hbm %s1481_s7, %s752_s22 }
  0x67   : > { %841 = vmatprep.subr.mxu1 %v1178_v0  ;;  %873 = vmatprep.mubr.msk.f32.mxu1 %vm1179_vm0, %v1178_v0  ;;  %v350_v6 = vld [vmem:[#allocation5 + $0x58] sm:$0xff]  ;;  %v447_v7 = vld [vmem:[#allocation7 + $0x70] sm:$0xff]  ;;  %v446_v8 = vld [vmem:[#allocation7 + $0x68] sm:$0xff]  ;;  %s635_s19 = sshll.u32 %s337_s18, 4  ;;  %s622_s1 = scalar_lea.sflag [#allocation4], %s1347_s15  ;;  %s636_s19 = int_to_ptr.vmem [resolvable:$true] %s635_s19 }
  0x68   : > { %807 = vmatpush3.msra.mxu0 %v354_v1  ;;  %842 = vmatpush3.msra.mxu1 %v448_v5  ;;  %v349_v9 = vld [vmem:[#allocation5 + $0x50] sm:$0xff]  ;;  %v445_v10 = vld [vmem:[#allocation7 + $0x60] sm:$0xff]  ;;  %v348_v11 = vld [vmem:[#allocation5 + $0x48] sm:$0xff]  ;;  %p1503_p6 = scmp.ne.s32.totalorder %s1495_s20, 0  ;;  %s1180_s28 = smov [#allocation10]  }
  0x69   : > { %808 = vmatprep.subr.mxu0 %v1178_v0  ;;  %843 = vmatprep.subr.mxu1 %v1178_v0  ;;  %v444_v12 = vld [vmem:[#allocation7 + $0x58] sm:$0xff]  ;;  %v347_v13 = vld [vmem:[#allocation5 + $0x40] sm:$0xff]  ;;  %v443_v14 = vld [vmem:[#allocation7 + $0x50] sm:$0xff]  ;;  %s1102_s30 = sshll.u32 %s1180_s28, 4  ;;  %s1103_s30 = int_to_ptr.vmem [resolvable:$false] %s1102_s30 }
  0x6a   : > { %809 = vmatpush3.msra.mxu0 %v353_v2  ;;  %844 = vmatpush3.msra.mxu1 %v447_v7  ;;  %v346_v15 = vld [vmem:[#allocation5 + $0x38] sm:$0xff]  ;;  %v442_v16 = vld [vmem:[#allocation7 + $0x48] sm:$0xff]  ;;  %v345_v17 = vld [vmem:[#allocation5 + $0x30] sm:$0xff]  ;;  %s1104_s12 = scalar_lea.vmem %s1103_s30, 256  ;;  %p1105_p5 = scmp.lt.s32.totalorder %s636_s19, %s1103_s30 }
  0x6b   : > { %810 = vmatprep.subr.mxu0 %v1178_v0  ;;  %845 = vmatprep.subr.mxu1 %v1178_v0  ;;  %v441_v18 = vld [vmem:[#allocation7 + $0x40] sm:$0xff]  ;;  %v344_v19 = vld [vmem:[#allocation5 + $0x28] sm:$0xff]  ;;  %v440_v20 = vld [vmem:[#allocation7 + $0x38] sm:$0xff] }
  0x6c   : > { %811 = vmatpush3.msra.mxu0 %v352_v3  ;;  %846 = vmatpush3.msra.mxu1 %v446_v8  ;;  %v343_v21 = vld [vmem:[#allocation5 + $0x20] sm:$0xff]  ;;  %v439_v22 = vld [vmem:[#allocation7 + $0x30] sm:$0xff]  ;;  %v342_v23 = vld [vmem:[#allocation5 + $0x18] sm:$0xff] }
  0x6d   : > { %812 = vmatprep.subr.mxu0 %v1178_v0  ;;  %847 = vmatprep.subr.mxu1 %v1178_v0  ;;  %v438_v24 = vld [vmem:[#allocation7 + $0x28] sm:$0xff]  ;;  %v341_v25 = vld [vmem:[#allocation5 + $0x10] sm:$0xff]  ;;  %v437_v26 = vld [vmem:[#allocation7 + $0x20] sm:$0xff] }
  0x6e   : > { %813 = vmatpush3.msra.mxu0 %v351_v4  ;;  %848 = vmatpush3.msra.mxu1 %v445_v10  ;;  %v340_v27 = vld [vmem:[#allocation5 + $0x8] sm:$0xff]  ;;  %v436_v28 = vld [vmem:[#allocation7 + $0x18] sm:$0xff]  ;;  %v339_v29 = vld [vmem:[#allocation5] sm:$0xff] }
  0x6f   : > { %814 = vmatprep.subr.mxu0 %v1178_v0  ;;  %849 = vmatprep.subr.mxu1 %v1178_v0  ;;  %v338_v30 = vld [vmem:[%s1353_s3] sm:$0xff]  ;;  %v434_v32 = vld [vmem:[#allocation7 + $0x8] sm:$0xff]  ;;  %v433_v33 = vld [vmem:[#allocation7] sm:$0xff]  ;;  %s1098_s3 = scalar_lea.vmem %s636_s19, 128 }
  0x70   : > { %815 = vmatpush3.msra.mxu0 %v350_v6  ;;  %850 = vmatpush3.msra.mxu1 %v444_v12  ;;  %v435_v31 = vld [vmem:[#allocation7 + $0x10] sm:$0xff]  ;;  %v542_v34 = vld [vmem:[#allocation8 + $0x78] sm:$0xff]  ;;  %v540_v36 = vld [vmem:[#allocation8 + $0x68] sm:$0xff]  ;;  %p1099_p4 = scmp.ne.s32.totalorder %s636_s19, %s1098_s3  ;;  %p1106_p3 = scmp.lt.s32.totalorder %s1104_s12, %s1098_s3 }
  0x71   : > { %816 = vmatprep.subr.mxu0 %v1178_v0  ;;  %851 = vmatprep.subr.mxu1 %v1178_v0  ;;  %v541_v35 = vld [vmem:[#allocation8 + $0x70] sm:$0xff]  ;;  %v539_v37 = vld [vmem:[#allocation8 + $0x60] sm:$0xff]  ;;  %v538_v38 = vld [vmem:[#allocation8 + $0x58] sm:$0xff] }
  0x72   : > { %817 = vmatpush3.msra.mxu0 %v349_v9  ;;  %852 = vmatpush3.msra.mxu1 %v443_v14  ;;  %v537_v39 = vld [vmem:[#allocation8 + $0x50] sm:$0xff]  ;;  %v536_v40 = vld [vmem:[#allocation8 + $0x48] sm:$0xff]  ;;  %v535_v41 = vld [vmem:[#allocation8 + $0x40] sm:$0xff]  ;;  %p1100_p12 = pnand %p1099_p4, %p1503_p6  ;;  %p1107_p7 = por %p1106_p3, %p1105_p5 }
  0x73   : > { %818 = vmatprep.subr.mxu0 %v1178_v0  ;;  %853 = vmatprep.subr.mxu1 %v1178_v0  ;;  %v534_v42 = vld [vmem:[#allocation8 + $0x38] sm:$0xff]  ;;  %v533_v43 = vld [vmem:[#allocation8 + $0x30] sm:$0xff]  ;;  %v532_v44 = vld [vmem:[#allocation8 + $0x28] sm:$0xff] }
  0x74   : > { %819 = vmatpush3.msra.mxu0 %v348_v11  ;;  %854 = vmatpush3.msra.mxu1 %v442_v16  ;;  %v531_v45 = vld [vmem:[#allocation8 + $0x20] sm:$0xff]  ;;  %v530_v46 = vld [vmem:[#allocation8 + $0x18] sm:$0xff]  ;;  %v748_v47 = vld [vmem:[%s1476_s2] ss:$0 sm:$0xff]  ;;  %p1101_p0 = pneg %p1100_p12 }
  0x75   : > { %820 = vmatprep.subr.mxu0 %v1178_v0  ;;  %855 = vmatprep.subr.mxu1 %v1178_v0  ;;  %v529_v52 = vld [vmem:[#allocation8 + $0x10] sm:$0xff]  ;;  %v528_v53 = vld [vmem:[#allocation8 + $0x8] sm:$0xff]  ;;  %v527_v54 = vld [vmem:[#allocation8] sm:$0xff] }
  0x76   : > { %821 = vmatpush3.msra.mxu0 %v347_v13  ;;  %856 = vmatpush3.msra.mxu1 %v441_v18  ;;  %v749_v55 = vld [vmem:[%s1478_s4] ss:$0 sm:$0xff]  ;;  %p1108_p9 = pnand %p1107_p7, %p1101_p0 }
  0x77   : > { %822 = vmatprep.subr.mxu0 %v1178_v0  ;;  %857 = vmatprep.subr.mxu1 %v1178_v0  ;;  %v750_v60 = vld [vmem:[%s1480_s6] ss:$0 sm:$0xff] }
  0x78   : > { %823 = vmatpush3.msra.mxu0 %v346_v15  ;;  %858 = vmatpush3.msra.mxu1 %v440_v20 }
  0x79   : > { %824 = vmatprep.subr.mxu0 %v1178_v0  ;;  %859 = vmatprep.subr.mxu1 %v1178_v0 }
  0x7a   : > { %825 = vmatpush3.msra.mxu0 %v345_v17  ;;  %860 = vmatpush3.msra.mxu1 %v439_v22 }
  0x7b   : > { %826 = vmatprep.subr.mxu0 %v1178_v0  ;;  %861 = vmatprep.subr.mxu1 %v1178_v0 }
  0x7c   : > { %827 = vmatpush3.msra.mxu0 %v344_v19  ;;  %862 = vmatpush3.msra.mxu1 %v438_v24 }
  0x7d   : > { %828 = vmatprep.subr.mxu0 %v1178_v0  ;;  %863 = vmatprep.subr.mxu1 %v1178_v0 }
  0x7e   : > { %829 = vmatpush3.msra.mxu0 %v343_v21  ;;  %864 = vmatpush3.msra.mxu1 %v437_v26 }
  0x7f   : > { %830 = vmatprep.subr.mxu0 %v1178_v0  ;;  %865 = vmatprep.subr.mxu1 %v1178_v0 }
  0x80   : > { %831 = vmatpush3.msra.mxu0 %v342_v23  ;;  %866 = vmatpush3.msra.mxu1 %v436_v28 }
  0x81   : > { %832 = vmatprep.subr.mxu0 %v1178_v0  ;;  %867 = vmatprep.subr.mxu1 %v1178_v0 }
  0x82   : > { %833 = vmatpush3.msra.mxu0 %v341_v25  ;;  %868 = vmatpush3.msra.mxu1 %v435_v31 }
  0x83   : > { %834 = vmatprep.subr.mxu0 %v1178_v0  ;;  %869 = vmatprep.subr.mxu1 %v1178_v0 }
  0x84   : > { %835 = vmatpush3.msra.mxu0 %v340_v27  ;;  %870 = vmatpush3.msra.mxu1 %v434_v32 }
  0x85   : > { %836 = vmatprep.subr.mxu0 %v1178_v0  ;;  %871 = vmatprep.subr.mxu1 %v1178_v0 }
  0x86   : > { %837 = vmatpush3.msra.mxu0 %v339_v29  ;;  %872 = vmatpush3.msra.mxu1 %v433_v33 }
  0x87   : > { %839 = vmatmul.mubr.f32.vlgmr.msra.gmra.mxu0 %v338_v30  ;;  %876 = vmatprep.subr.mxu0 %v1178_v0 }
  0x88   : > { %908 = vmatprep.mubr.msk.f32.mxu0 %vm1179_vm0, %v1178_v0  ;;  %877 = vmatpush3.msra.mxu0 %v542_v34 }
  0x89   : > { %878 = vmatprep.subr.mxu0 %v1178_v0 }
  0x8a   : > { %879 = vmatpush3.msra.mxu0 %v541_v35 }
  0x8b   : > { %880 = vmatprep.subr.mxu0 %v1178_v0 }
  0x8c   : > { %881 = vmatpush3.msra.mxu0 %v540_v36 }
  0x8d   : > { %882 = vmatprep.subr.mxu0 %v1178_v0 }
  0x8e   : > { %883 = vmatpush3.msra.mxu0 %v539_v37 }
  0x8f   : > { %884 = vmatprep.subr.mxu0 %v1178_v0 }
  0x90   : > { %885 = vmatpush3.msra.mxu0 %v538_v38 }
  0x91   : > { %886 = vmatprep.subr.mxu0 %v1178_v0 }
  0x92   : > { %887 = vmatpush3.msra.mxu0 %v537_v39 }
  0x93   : > { %888 = vmatprep.subr.mxu0 %v1178_v0 }
  0x94   : > { %889 = vmatpush3.msra.mxu0 %v536_v40 }
  0x95   : > { %890 = vmatprep.subr.mxu0 %v1178_v0 }
  0x96   : > { %891 = vmatpush3.msra.mxu0 %v535_v41 }
  0x97   : > { %892 = vmatprep.subr.mxu0 %v1178_v0 }
  0x98   : > { %893 = vmatpush3.msra.mxu0 %v534_v42 }
  0x99   : > { %894 = vmatprep.subr.mxu0 %v1178_v0 }
  0x9a   : > { %895 = vmatpush3.msra.mxu0 %v533_v43 }
  0x9b   : > { %896 = vmatprep.subr.mxu0 %v1178_v0 }
  0x9c   : > { %897 = vmatpush3.msra.mxu0 %v532_v44 }
  0x9d   : > { %898 = vmatprep.subr.mxu0 %v1178_v0 }
  0x9e   : > { %899 = vmatpush3.msra.mxu0 %v531_v45 }
  0x9f   : > { %900 = vmatprep.subr.mxu0 %v1178_v0 }
  0xa0   : > { %901 = vmatpush3.msra.mxu0 %v530_v46 }
  0xa1   : > { %902 = vmatprep.subr.mxu0 %v1178_v0 }
  0xa2   : > { %903 = vmatpush3.msra.mxu0 %v529_v52 }
  0xa3   : > { %904 = vmatprep.subr.mxu0 %v1178_v0 }
  0xa4   : > { %905 = vmatpush3.msra.mxu0 %v528_v53 }
  0xa5   : > { %906 = vmatprep.subr.mxu0 %v1178_v0 }
  0xa6   : > { %907 = vmatpush3.msra.mxu0 %v527_v54 }
 0x147   : > { %v428_v48 = vpop.f32.mrf.mxu0 }
 0x148   : > { %v429_v49 = vadd.f32 %v748_v47, %v428_v48 }
 0x149   : > { %v840_v50 = vpop.f32.mrf.mxu0 }
 0x14a   : > { %v432_v51 = vmax.f32 %v429_v49, 0.0 }
 0x14c   : > { %874 = vmatmul.mubr.f32.vlgmr.msra.gmra.mxu1 %v432_v51 }
 0x20c   : > { %v522_v56 = vpop.f32.mrf.mxu1 }
 0x20d   : > { %v523_v57 = vadd.f32 %v749_v55, %v522_v56 }
 0x20e   : > { %v875_v58 = vpop.f32.mrf.mxu1 }
 0x20f   : > { %v526_v59 = vmax.f32 %v523_v57, 0.0 }
 0x211   : > { %909 = vmatmul.mubr.f32.vlgmr.msra.gmra.mxu0 %v526_v59 }
 0x2d1   : > { %v616_v61 = vpop.f32.mrf.mxu0 }
 0x2d2   : > { %v617_v62 = vadd.f32 %v750_v60, %v616_v61 }
 0x2d3   : > { %v910_v63 = vpop.f32.mrf.mxu0 }
 0x2d4   : > { %620 = vst [vmem:[%s337_s18] sm:$0xff] %v617_v62 }
 0x2d5   : > { %1111 = shalt.err (!%p1108_p9)
}
 0x2d6   : > { %s1112_s9 = scalar_lea.hbm %s1437_s21, 128  ;;  %s1116_s10 = scalar_lea.hbm %s1481_s7, 256 }
 0x2d7   : > { %p1113_p13 = scmp.ne.s32.totalorder %s1437_s21, %s1112_s9  ;;  %p1117_p11 = scmp.lt.s32.totalorder %s1437_s21, %s1481_s7 }
 0x2d8   : > { %p1118_p1 = scmp.lt.s32.totalorder %s1116_s10, %s1112_s9 }
 0x2d9   : > { %p1114_p8 = pnand %p1113_p13, %p1503_p6 }
 0x2da   : > { %p1119_p2 = por %p1118_p1, %p1117_p11 }
 0x2db   : > { %p1115_p10 = pneg %p1114_p8 }
 0x2dd   : > { %p1120_p4 = pnand %p1119_p2, %p1115_p10 }
 0x2df   : > { %1123 = shalt.err (!%p1120_p4)
}
 0x2e0   : > { %925 = dma.vmem_to_hbm [thread:$0]  (%p1503_p6), %s636_s19, 128, %s1437_s21, %s622_s1  }
 0x2e1 PF: > { %s647_s22 = sand.u32 1, %s1158_s24   ;;  %p1504_p12 = scmp.ne.s32.totalorder %s1489_s8, 0 }
 0x2e2   : > { %p1505_p0 = scmp.ge.s32.totalorder %s1170_s27, 2  ;;  %s648_s18 = scalar_lea.sflag [#allocation4], %s647_s22 }
 0x2e4   : > { %p942_p5 = pnand %p1505_p0, %p1504_p12 }
 0x2e6   : > { %p943_p3 = pneg %p942_p5 }
 0x2e8   : > { %1153 = dma.done.wait (%p943_p3), %s648_s18, 128  }
 0x2e9   : > { %1155 = vsyncadd (%p943_p3), %s648_s18, 4294967168  ;;  %p22_p7 = scmp.ge.s32.totalorder %s1301_s14, 4   ;;  %s1506_s24 = smov %s1162_s25 }
 0x2ea   : > { %s1507_s25 = smov %s1166_s26  ;;  %s1508_s26 = smov %s1311_s17 }
 0x2eb   : > { %s1509_s27 = smov %s1301_s14  ;;  %24 = sbr.rel (!%p22_p7) target bundleno = 10 (0xa), region = 105 }
 0x2f0   :  { %653 = vsyncpa [#allocation3], 1 }
 0x2f1   :  { %655 = vsyncpa [#allocation3 + $0x1], 1 }
 0x2f2   :  { %656 = vsyncpa [#allocation6], 1 }
 0x2f3   :  { %657 = vsyncpa [#allocation9], 1 }
 0x2f4   :  { %658 = vsyncpa [#allocation4], 1 }
 0x2f5   :  { %660 = vsyncpa [#allocation4 + $0x1], 1 }

// kernel: tpu_custom_call.1
= control target key start
LH: loop header
LB: loop body
LE: loop exit
PB: predicated region body
PF: predicated region fallthrough
CT: control target
= control target key end

     0   :  { %s1474_s0 = inlined_call_operand.hbm [shape: f32[16,128], index: 0, kind: input, shape index: {}]   ;;  %s1475_s1 = inlined_call_operand.hbm [shape: f32[128,128], index: 1, kind: input, shape index: {}]   ;;  %s1476_s2 = inlined_call_operand.vmem [shape: f32[1,128], index: 2, kind: input, shape index: {}]   ;;  %s1477_s3 = inlined_call_operand.hbm [shape: f32[128,128], index: 3, kind: input, shape index: {}]   ;;  %s1478_s4 = inlined_call_operand.vmem [shape: f32[1,128], index: 4, kind: input, shape index: {}]   ;;  %s1479_s5 = inlined_call_operand.hbm [shape: f32[128,128], index: 5, kind: input, shape index: {}]   ;;  %s1480_s6 = inlined_call_operand.vmem [shape: f32[1,128], index: 6, kind: input, shape index: {}]   ;;  %s1481_s7 = inlined_call_operand.hbm [shape: f32[16,128], index: 7, kind: output, shape index: {}]  }
   0x1   :  { %1486 = sst [smem:[#allocation15_spill]] %s1475_s1 }
   0x2   :  { %1487 = sst [smem:[#allocation16_spill]] %s1477_s3 }
   0x3   :  { %12 = vsyncpa [#allocation3], 0 }
   0x4   :  { %14 = vsyncpa [#allocation3 + $0x1], 0 }
   0x5   :  { %15 = vsyncpa [#allocation6], 0 }
   0x6   :  { %16 = vsyncpa [#allocation9], 0 }
   0x7   :  { %17 = vsyncpa [#allocation4], 0 }
   0x8   :  { %19 = vsyncpa [#allocation4 + $0x1], 0  ;;  %s1221_s24 = smov 0   ;;  %s1223_s25 = smov 0  }
   0x9   :  { %s1225_s26 = smov 0   ;;  %s1227_s27 = smov 0  }
   0xa LB: > { %s1242_s28 = sadd.s32 4294967295, %s1170_s27   ;;  %s734_s29 = sadd.s32 4294967294, %s1170_s27   ;;  %s1170_s27 = sphi %s1227_s27, %s1509_s27   ;;  %s1166_s26 = sphi %s1225_s26, %s1508_s26   ;;  %s1162_s25 = sphi %s1223_s25, %s1507_s25   ;;  %s1158_s24 = sphi %s1221_s24, %s1506_s24  }
   0xb   : > { %p45_p0 = scmp.ne.s32.totalorder %s1162_s25, %s1158_s24  ;;  %p1482_p1 = scmp.eq.s32.totalorder %s1242_s28, 0 }
   0xc   : > { %p201_p3 = scmp.eq.s32.totalorder %s734_s29, 1  ;;  %p735_p5 = scmp.ge.s32.totalorder %s1170_s27, 1 }
   0xd   : > { %p1251_p4 = por %p1482_p1, %p45_p0  ;;  %p208_p7 = scmp.lt.s32.totalorder %s1170_s27, 3 }
   0xe   : > { %p1256_p6 = por %p201_p3, %p45_p0  ;;  %s1172_s10 = smov [#allocation5]  }
   0xf   : > { %s1488_s30 = scalar_select %p1251_p4, 1, 0 }
  0x10   : > { %s1489_s8 = scalar_select %p1256_p6, 1, 0 }
  0x11   : > { %p1261_p8 = pnand %p735_p5, %p208_p7  ;;  %s220_s11 = sshll.u32 %s1172_s10, 4  ;;  %s221_s11 = int_to_ptr.vmem [resolvable:$true] %s220_s11 }
  0x12   : > { %s1173_s13 = smov [#allocation7]   ;;  %s1174_s15 = smov [#allocation8]  }
  0x13   : > { %s1490_s9 = scalar_select %p1261_p8, 1, 0 }
  0x14   : > { %p927_p9 = pneg %p1261_p8  ;;  %s236_s14 = sshll.u32 %s1173_s13, 4  ;;  %s237_s14 = int_to_ptr.vmem [resolvable:$true] %s236_s14 }
  0x15   : > { %s252_s16 = sshll.u32 %s1174_s15, 4  ;;  %s1003_s17 = scalar_lea.vmem %s221_s11, 2048  ;;  %s253_s16 = int_to_ptr.vmem [resolvable:$true] %s252_s16 }
  0x16   : > { %p1270_p11 = pnand %p927_p9, %p1482_p1  ;;  %p1004_p13 = scmp.ne.s32.totalorder %s221_s11, %s1003_s17 }
  0x17   : > { %p1011_p5 = scmp.lt.s32.totalorder %s221_s11, %s221_s11  ;;  %p1012_p7 = scmp.lt.s32.totalorder %s1003_s17, %s1003_s17 }
  0x18   : > { %p994_p12 = pneg %p1270_p11 }
  0x19   : > { %p1013_p9 = por %p1012_p7, %p1011_p5 }
  0x1a   : > { %p1006_p0 = pnand %p1004_p13, %p994_p12 }
  0x1c   : > { %p1007_p3 = pneg %p1006_p0 }
  0x1e   : > { %p1014_p10 = pnand %p1013_p9, %p1007_p3 }
  0x20   : > { %1017 = shalt.err (!%p1014_p10)
}
  0x21   : > { %s1175_s18 = smov 128   ;;  %s1176_s19 = smov 8  }
  0x22   : > { %s1492_s1 = sld [smem:[#allocation15_spill]]  ;;  %s1029_s22 = scalar_lea.vmem %s237_s14, 2048 }
  0x23   : > { %p1030_p1 = scmp.ne.s32.totalorder %s237_s14, %s1029_s22  ;;  %p1037_p2 = scmp.lt.s32.totalorder %s237_s14, %s237_s14 }
  0x24   : > { %p1038_p6 = scmp.lt.s32.totalorder %s1029_s22, %s1029_s22 }
  0x25   : > { %p1032_p13 = pnand %p1030_p1, %p994_p12 }
  0x26   : > { %p1039_p5 = por %p1038_p6, %p1037_p2 }
  0x27   : > { %p1033_p0 = pneg %p1032_p13 }
  0x28   : > { %930 = dma.hbm_to_vmem [thread:$0]  (!%p1270_p11), %s1492_s1, 2048, %s221_s11, [#allocation6], %s1175_s18, %s1175_s18, %s1176_s19  }
  0x29   : > { %p1040_p3 = pnand %p1039_p5, %p1033_p0 }
  0x2b   : > { %1043 = shalt.err (!%p1040_p3)
}
  0x2c   : > { %s1493_s3 = sld [smem:[#allocation16_spill]]  ;;  %s1055_s10 = scalar_lea.vmem %s253_s16, 2048 }
  0x2d   : > { %p1056_p10 = scmp.ne.s32.totalorder %s253_s16, %s1055_s10  ;;  %p1063_p9 = scmp.lt.s32.totalorder %s253_s16, %s253_s16 }
  0x2e   : > { %p1064_p13 = scmp.lt.s32.totalorder %s1055_s10, %s1055_s10 }
  0x2f   : > { %p1058_p7 = pnand %p1056_p10, %p994_p12 }
  0x30   : > { %p1065_p4 = por %p1064_p13, %p1063_p9 }
  0x31   : > { %p1059_p1 = pneg %p1058_p7 }
  0x32   : > { %933 = dma.hbm_to_vmem [thread:$0]  (!%p1270_p11), %s1493_s3, 2048, %s237_s14, [#allocation6], %s1175_s18, %s1175_s18, %s1176_s19  }
  0x33   : > { %p1066_p2 = pnand %p1065_p4, %p1059_p1 }
  0x35   : > { %1069 = shalt.err (!%p1066_p2)
}
  0x36   : > { %936 = dma.hbm_to_vmem [thread:$0]  (!%p1270_p11), %s1479_s5, 2048, %s253_s16, [#allocation9], %s1175_s18, %s1175_s18, %s1176_s19  }
  0x37   : > { %s1301_s14 = sadd.s32 1, %s1170_s27   ;;  %s32_s12 = sadd.s32 1, %s1166_s26 }
  0x38   : > { %s29_s15 = ssub.s32 %s1170_s27, %s1301_s14  ;;  %p39_p6 = scmp.ne.s32.totalorder %s1166_s26, %s1162_s25 }
  0x39   : > { %p30_p4 = scmp.eq.s32.totalorder %s29_s15, 0  ;;  %p40_p12 = scmp.eq.s32.totalorder %s1170_s27, 0 }
  0x3a   : > { %p948_p0 = scmp.lt.s32.totalorder %s1170_s27, 2  ;;  %p1494_p3 = scmp.eq.s32.totalorder %s1242_s28, 1 }
  0x3b   : > { %s1311_s17 = scalar_select %p30_p4, %s1166_s26, %s32_s12  }
  0x3c   : > { %p41_p5 = por %p40_p12, %p39_p6  ;;  %p1315_p10 = por %p1494_p3, %p39_p6 }
  0x3d   : > { %s269_s21 = sand.u32 1, %s1166_s26   ;;  %s741_s22 = sshll.u32 %s1170_s27, 7 }
  0x3e   : > { %s1495_s20 = scalar_select %p1315_p10, 1, 0 }
  0x3f   : > { %s740_s16 = sshll.u32 %s269_s21, 3  ;;  %s1324_s23 = scalar_lea.hbm %s1474_s0, %s741_s22 }
  0x40   : > { %s273_s29 = scalar_lea.vmem [#allocation2], %s740_s16  ;;  %p1326_p11 = pnand %p948_p0, %p41_p5 }
  0x41   : > { %s280_s10 = sshll.u32 %s273_s29, 4  ;;  %s270_s13 = scalar_lea.sflag [#allocation3], %s269_s21  ;;  %s281_s10 = int_to_ptr.vmem [resolvable:$true] %s280_s10 }
  0x42   : > { %s1070_s15 = scalar_lea.hbm %s1324_s23, 128  ;;  %p1072_p1 = pneg %p1326_p11 }
  0x43   : > { %p1071_p7 = scmp.ne.s32.totalorder %s1324_s23, %s1070_s15  ;;  %s1075_s18 = scalar_lea.hbm %s1474_s0, 256 }
  0x44   : > { %p1076_p2 = scmp.lt.s32.totalorder %s1324_s23, %s1474_s0  ;;  %p1077_p4 = scmp.lt.s32.totalorder %s1075_s18, %s1070_s15 }
  0x45   : > { %p1073_p9 = pnand %p1072_p1, %p1071_p7 }
  0x46   : > { %p1078_p6 = por %p1077_p4, %p1076_p2 }
  0x47   : > { %p1074_p13 = pneg %p1073_p9 }
  0x49   : > { %p1079_p12 = pnand %p1078_p6, %p1074_p13 }
  0x4b   : > { %1082 = shalt.err (!%p1079_p12)
}
  0x4c   : > { %s1083_s29 = scalar_lea.vmem %s281_s10, 128  ;;  %s1177_s21 = smov [#allocation2]  }
  0x4d   : > { %p1084_p0 = scmp.ne.s32.totalorder %s281_s10, %s1083_s29  ;;  %s1088_s1 = sshll.u32 %s1177_s21, 4  ;;  %s1089_s1 = int_to_ptr.vmem [resolvable:$false] %s1088_s1 }
  0x4e   : > { %s1090_s3 = scalar_lea.vmem %s1089_s1, 256  ;;  %p1091_p7 = scmp.lt.s32.totalorder %s281_s10, %s1089_s1 }
  0x4f   : > { %p1086_p5 = pnand %p1084_p0, %p1072_p1  ;;  %p1092_p9 = scmp.lt.s32.totalorder %s1090_s3, %s1083_s29 }
  0x51   : > { %p1087_p3 = pneg %p1086_p5  ;;  %p1093_p10 = por %p1092_p9, %p1091_p7 }
  0x53   : > { %p1094_p8 = pnand %p1093_p10, %p1087_p3 }
  0x55   : > { %1097 = shalt.err (!%p1094_p8)
}
  0x56   : > { %940 = dma.hbm_to_vmem [thread:$0]  (!%p1326_p11), %s1324_s23, 128, %s281_s10, %s270_s13  }
  0x57   : > { %p1497_p13 = scmp.ne.s32.totalorder %s1490_s9, 0 }
  0x58   : > { %s1347_s15 = sand.u32 (!%p1497_p13), 1, %s1162_s25   ;;  %p1498_p8 = scmp.ne.s32.totalorder (!%p1497_p13), %s1488_s30, 0 }
  0x59   : > { %289 = sbr.rel (%p1497_p13) target bundleno = 737 (0x2e1), region = 48  ;;  %s743_s12 = sshll.u32 (!%p1497_p13), %s1347_s15, 3 }
  0x5a   : > { %s292_s1 = scalar_lea.sflag (!%p1497_p13), [#allocation3], %s1347_s15  ;;  %s1353_s3 = scalar_lea.vmem (!%p1497_p13), [#allocation2], %s743_s12 }
  0x5e   : > { %1141 = dma.done.wait (%p1498_p8), %s292_s1, 128  }
  0x5f   : > { %1143 = vsyncadd (%p1498_p8), %s292_s1, 4294967168  ;;  %p1499_p10 = scmp.eq.s32.totalorder %s1242_s28, 0 }
  0x61   : > { %1145 = dma.done.wait (%p1499_p10), [#allocation6], 4096   ;;  %p1500_p11 = pmov %p1499_p10 }
  0x62   : > { %p1501_p1 = pmov %p1499_p10 }
  0x63   : > { %1147 = vsyncadd (%p1500_p11), [#allocation6], 4294963200 }
  0x64   : > { %1149 = dma.done.wait (%p1501_p1), [#allocation9], 2048   ;;  %p1502_p2 = pmov %p1501_p1 }
  0x65   : > { %v1178_v0 = vmov 0.0   ;;  %vm1179_vm0 = vmmov 0   ;;  %v354_v1 = vld [vmem:[#allocation5 + $0x78] sm:$0xff]  ;;  %v353_v2 = vld [vmem:[#allocation5 + $0x70] sm:$0xff]  ;;  %v352_v3 = vld [vmem:[#allocation5 + $0x68] sm:$0xff]  ;;  %s752_s22 = sshll.u32 %s1242_s28, 7 }
  0x66   : > { %1151 = vsyncadd (%p1502_p2), [#allocation9], 4294965248  ;;  %806 = vmatprep.subr.mxu0 %v1178_v0  ;;  %838 = vmatprep.mubr.msk.f32.mxu0 %vm1179_vm0, %v1178_v0  ;;  %v351_v4 = vld [vmem:[#allocation5 + $0x60] sm:$0xff]  ;;  %v448_v5 = vld [vmem:[#allocation7 + $0x78] sm:$0xff]  ;;  %s337_s18 = scalar_lea.vmem [#allocation10], %s743_s12  ;;  %s1437_s21 = scalar_lea.hbm %s1481_s7, %s752_s22 }
  0x67   : > { %841 = vmatprep.subr.mxu1 %v1178_v0  ;;  %873 = vmatprep.mubr.msk.f32.mxu1 %vm1179_vm0, %v1178_v0  ;;  %v350_v6 = vld [vmem:[#allocation5 + $0x58] sm:$0xff]  ;;  %v447_v7 = vld [vmem:[#allocation7 + $0x70] sm:$0xff]  ;;  %v446_v8 = vld [vmem:[#allocation7 + $0x68] sm:$0xff]  ;;  %s635_s19 = sshll.u32 %s337_s18, 4  ;;  %s622_s1 = scalar_lea.sflag [#allocation4], %s1347_s15  ;;  %s636_s19 = int_to_ptr.vmem [resolvable:$true] %s635_s19 }
  0x68   : > { %807 = vmatpush3.msra.mxu0 %v354_v1  ;;  %842 = vmatpush3.msra.mxu1 %v448_v5  ;;  %v349_v9 = vld [vmem:[#allocation5 + $0x50] sm:$0xff]  ;;  %v445_v10 = vld [vmem:[#allocation7 + $0x60] sm:$0xff]  ;;  %v348_v11 = vld [vmem:[#allocation5 + $0x48] sm:$0xff]  ;;  %p1503_p6 = scmp.ne.s32.totalorder %s1495_s20, 0  ;;  %s1180_s28 = smov [#allocation10]  }
  0x69   : > { %808 = vmatprep.subr.mxu0 %v1178_v0  ;;  %843 = vmatprep.subr.mxu1 %v1178_v0  ;;  %v444_v12 = vld [vmem:[#allocation7 + $0x58] sm:$0xff]  ;;  %v347_v13 = vld [vmem:[#allocation5 + $0x40] sm:$0xff]  ;;  %v443_v14 = vld [vmem:[#allocation7 + $0x50] sm:$0xff]  ;;  %s1102_s30 = sshll.u32 %s1180_s28, 4  ;;  %s1103_s30 = int_to_ptr.vmem [resolvable:$false] %s1102_s30 }
  0x6a   : > { %809 = vmatpush3.msra.mxu0 %v353_v2  ;;  %844 = vmatpush3.msra.mxu1 %v447_v7  ;;  %v346_v15 = vld [vmem:[#allocation5 + $0x38] sm:$0xff]  ;;  %v442_v16 = vld [vmem:[#allocation7 + $0x48] sm:$0xff]  ;;  %v345_v17 = vld [vmem:[#allocation5 + $0x30] sm:$0xff]  ;;  %s1104_s12 = scalar_lea.vmem %s1103_s30, 256  ;;  %p1105_p5 = scmp.lt.s32.totalorder %s636_s19, %s1103_s30 }
  0x6b   : > { %810 = vmatprep.subr.mxu0 %v1178_v0  ;;  %845 = vmatprep.subr.mxu1 %v1178_v0  ;;  %v441_v18 = vld [vmem:[#allocation7 + $0x40] sm:$0xff]  ;;  %v344_v19 = vld [vmem:[#allocation5 + $0x28] sm:$0xff]  ;;  %v440_v20 = vld [vmem:[#allocation7 + $0x38] sm:$0xff] }
  0x6c   : > { %811 = vmatpush3.msra.mxu0 %v352_v3  ;;  %846 = vmatpush3.msra.mxu1 %v446_v8  ;;  %v343_v21 = vld [vmem:[#allocation5 + $0x20] sm:$0xff]  ;;  %v439_v22 = vld [vmem:[#allocation7 + $0x30] sm:$0xff]  ;;  %v342_v23 = vld [vmem:[#allocation5 + $0x18] sm:$0xff] }
  0x6d   : > { %812 = vmatprep.subr.mxu0 %v1178_v0  ;;  %847 = vmatprep.subr.mxu1 %v1178_v0  ;;  %v438_v24 = vld [vmem:[#allocation7 + $0x28] sm:$0xff]  ;;  %v341_v25 = vld [vmem:[#allocation5 + $0x10] sm:$0xff]  ;;  %v437_v26 = vld [vmem:[#allocation7 + $0x20] sm:$0xff] }
  0x6e   : > { %813 = vmatpush3.msra.mxu0 %v351_v4  ;;  %848 = vmatpush3.msra.mxu1 %v445_v10  ;;  %v340_v27 = vld [vmem:[#allocation5 + $0x8] sm:$0xff]  ;;  %v436_v28 = vld [vmem:[#allocation7 + $0x18] sm:$0xff]  ;;  %v339_v29 = vld [vmem:[#allocation5] sm:$0xff] }
  0x6f   : > { %814 = vmatprep.subr.mxu0 %v1178_v0  ;;  %849 = vmatprep.subr.mxu1 %v1178_v0  ;;  %v338_v30 = vld [vmem:[%s1353_s3] sm:$0xff]  ;;  %v434_v32 = vld [vmem:[#allocation7 + $0x8] sm:$0xff]  ;;  %v433_v33 = vld [vmem:[#allocation7] sm:$0xff]  ;;  %s1098_s3 = scalar_lea.vmem %s636_s19, 128 }
  0x70   : > { %815 = vmatpush3.msra.mxu0 %v350_v6  ;;  %850 = vmatpush3.msra.mxu1 %v444_v12  ;;  %v435_v31 = vld [vmem:[#allocation7 + $0x10] sm:$0xff]  ;;  %v542_v34 = vld [vmem:[#allocation8 + $0x78] sm:$0xff]  ;;  %v540_v36 = vld [vmem:[#allocation8 + $0x68] sm:$0xff]  ;;  %p1099_p4 = scmp.ne.s32.totalorder %s636_s19, %s1098_s3  ;;  %p1106_p3 = scmp.lt.s32.totalorder %s1104_s12, %s1098_s3 }
  0x71   : > { %816 = vmatprep.subr.mxu0 %v1178_v0  ;;  %851 = vmatprep.subr.mxu1 %v1178_v0  ;;  %v541_v35 = vld [vmem:[#allocation8 + $0x70] sm:$0xff]  ;;  %v539_v37 = vld [vmem:[#allocation8 + $0x60] sm:$0xff]  ;;  %v538_v38 = vld [vmem:[#allocation8 + $0x58] sm:$0xff] }
  0x72   : > { %817 = vmatpush3.msra.mxu0 %v349_v9  ;;  %852 = vmatpush3.msra.mxu1 %v443_v14  ;;  %v537_v39 = vld [vmem:[#allocation8 + $0x50] sm:$0xff]  ;;  %v536_v40 = vld [vmem:[#allocation8 + $0x48] sm:$0xff]  ;;  %v535_v41 = vld [vmem:[#allocation8 + $0x40] sm:$0xff]  ;;  %p1100_p12 = pnand %p1099_p4, %p1503_p6  ;;  %p1107_p7 = por %p1106_p3, %p1105_p5 }
  0x73   : > { %818 = vmatprep.subr.mxu0 %v1178_v0  ;;  %853 = vmatprep.subr.mxu1 %v1178_v0  ;;  %v534_v42 = vld [vmem:[#allocation8 + $0x38] sm:$0xff]  ;;  %v533_v43 = vld [vmem:[#allocation8 + $0x30] sm:$0xff]  ;;  %v532_v44 = vld [vmem:[#allocation8 + $0x28] sm:$0xff] }
  0x74   : > { %819 = vmatpush3.msra.mxu0 %v348_v11  ;;  %854 = vmatpush3.msra.mxu1 %v442_v16  ;;  %v531_v45 = vld [vmem:[#allocation8 + $0x20] sm:$0xff]  ;;  %v530_v46 = vld [vmem:[#allocation8 + $0x18] sm:$0xff]  ;;  %v748_v47 = vld [vmem:[%s1476_s2] ss:$0 sm:$0xff]  ;;  %p1101_p0 = pneg %p1100_p12 }
  0x75   : > { %820 = vmatprep.subr.mxu0 %v1178_v0  ;;  %855 = vmatprep.subr.mxu1 %v1178_v0  ;;  %v529_v52 = vld [vmem:[#allocation8 + $0x10] sm:$0xff]  ;;  %v528_v53 = vld [vmem:[#allocation8 + $0x8] sm:$0xff]  ;;  %v527_v54 = vld [vmem:[#allocation8] sm:$0xff] }
  0x76   : > { %821 = vmatpush3.msra.mxu0 %v347_v13  ;;  %856 = vmatpush3.msra.mxu1 %v441_v18  ;;  %v749_v55 = vld [vmem:[%s1478_s4] ss:$0 sm:$0xff]  ;;  %p1108_p9 = pnand %p1107_p7, %p1101_p0 }
  0x77   : > { %822 = vmatprep.subr.mxu0 %v1178_v0  ;;  %857 = vmatprep.subr.mxu1 %v1178_v0  ;;  %v750_v60 = vld [vmem:[%s1480_s6] ss:$0 sm:$0xff] }
  0x78   : > { %823 = vmatpush3.msra.mxu0 %v346_v15  ;;  %858 = vmatpush3.msra.mxu1 %v440_v20 }
  0x79   : > { %824 = vmatprep.subr.mxu0 %v1178_v0  ;;  %859 = vmatprep.subr.mxu1 %v1178_v0 }
  0x7a   : > { %825 = vmatpush3.msra.mxu0 %v345_v17  ;;  %860 = vmatpush3.msra.mxu1 %v439_v22 }
  0x7b   : > { %826 = vmatprep.subr.mxu0 %v1178_v0  ;;  %861 = vmatprep.subr.mxu1 %v1178_v0 }
  0x7c   : > { %827 = vmatpush3.msra.mxu0 %v344_v19  ;;  %862 = vmatpush3.msra.mxu1 %v438_v24 }
  0x7d   : > { %828 = vmatprep.subr.mxu0 %v1178_v0  ;;  %863 = vmatprep.subr.mxu1 %v1178_v0 }
  0x7e   : > { %829 = vmatpush3.msra.mxu0 %v343_v21  ;;  %864 = vmatpush3.msra.mxu1 %v437_v26 }
  0x7f   : > { %830 = vmatprep.subr.mxu0 %v1178_v0  ;;  %865 = vmatprep.subr.mxu1 %v1178_v0 }
  0x80   : > { %831 = vmatpush3.msra.mxu0 %v342_v23  ;;  %866 = vmatpush3.msra.mxu1 %v436_v28 }
  0x81   : > { %832 = vmatprep.subr.mxu0 %v1178_v0  ;;  %867 = vmatprep.subr.mxu1 %v1178_v0 }
  0x82   : > { %833 = vmatpush3.msra.mxu0 %v341_v25  ;;  %868 = vmatpush3.msra.mxu1 %v435_v31 }
  0x83   : > { %834 = vmatprep.subr.mxu0 %v1178_v0  ;;  %869 = vmatprep.subr.mxu1 %v1178_v0 }
  0x84   : > { %835 = vmatpush3.msra.mxu0 %v340_v27  ;;  %870 = vmatpush3.msra.mxu1 %v434_v32 }
  0x85   : > { %836 = vmatprep.subr.mxu0 %v1178_v0  ;;  %871 = vmatprep.subr.mxu1 %v1178_v0 }
  0x86   : > { %837 = vmatpush3.msra.mxu0 %v339_v29  ;;  %872 = vmatpush3.msra.mxu1 %v433_v33 }
  0x87   : > { %839 = vmatmul.mubr.f32.vlgmr.msra.gmra.mxu0 %v338_v30  ;;  %876 = vmatprep.subr.mxu0 %v1178_v0 }
  0x88   : > { %908 = vmatprep.mubr.msk.f32.mxu0 %vm1179_vm0, %v1178_v0  ;;  %877 = vmatpush3.msra.mxu0 %v542_v34 }
  0x89   : > { %878 = vmatprep.subr.mxu0 %v1178_v0 }
  0x8a   : > { %879 = vmatpush3.msra.mxu0 %v541_v35 }
  0x8b   : > { %880 = vmatprep.subr.mxu0 %v1178_v0 }
  0x8c   : > { %881 = vmatpush3.msra.mxu0 %v540_v36 }
  0x8d   : > { %882 = vmatprep.subr.mxu0 %v1178_v0 }
  0x8e   : > { %883 = vmatpush3.msra.mxu0 %v539_v37 }
  0x8f   : > { %884 = vmatprep.subr.mxu0 %v1178_v0 }
  0x90   : > { %885 = vmatpush3.msra.mxu0 %v538_v38 }
  0x91   : > { %886 = vmatprep.subr.mxu0 %v1178_v0 }
  0x92   : > { %887 = vmatpush3.msra.mxu0 %v537_v39 }
  0x93   : > { %888 = vmatprep.subr.mxu0 %v1178_v0 }
  0x94   : > { %889 = vmatpush3.msra.mxu0 %v536_v40 }
  0x95   : > { %890 = vmatprep.subr.mxu0 %v1178_v0 }
  0x96   : > { %891 = vmatpush3.msra.mxu0 %v535_v41 }
  0x97   : > { %892 = vmatprep.subr.mxu0 %v1178_v0 }
  0x98   : > { %893 = vmatpush3.msra.mxu0 %v534_v42 }
  0x99   : > { %894 = vmatprep.subr.mxu0 %v1178_v0 }
  0x9a   : > { %895 = vmatpush3.msra.mxu0 %v533_v43 }
  0x9b   : > { %896 = vmatprep.subr.mxu0 %v1178_v0 }
  0x9c   : > { %897 = vmatpush3.msra.mxu0 %v532_v44 }
  0x9d   : > { %898 = vmatprep.subr.mxu0 %v1178_v0 }
  0x9e   : > { %899 = vmatpush3.msra.mxu0 %v531_v45 }
  0x9f   : > { %900 = vmatprep.subr.mxu0 %v1178_v0 }
  0xa0   : > { %901 = vmatpush3.msra.mxu0 %v530_v46 }
  0xa1   : > { %902 = vmatprep.subr.mxu0 %v1178_v0 }
  0xa2   : > { %903 = vmatpush3.msra.mxu0 %v529_v52 }
  0xa3   : > { %904 = vmatprep.subr.mxu0 %v1178_v0 }
  0xa4   : > { %905 = vmatpush3.msra.mxu0 %v528_v53 }
  0xa5   : > { %906 = vmatprep.subr.mxu0 %v1178_v0 }
  0xa6   : > { %907 = vmatpush3.msra.mxu0 %v527_v54 }
 0x147   : > { %v428_v48 = vpop.f32.mrf.mxu0 }
 0x148   : > { %v429_v49 = vadd.f32 %v748_v47, %v428_v48 }
 0x149   : > { %v840_v50 = vpop.f32.mrf.mxu0 }
 0x14a   : > { %v432_v51 = vmax.f32 %v429_v49, 0.0 }
 0x14c   : > { %874 = vmatmul.mubr.f32.vlgmr.msra.gmra.mxu1 %v432_v51 }
 0x20c   : > { %v522_v56 = vpop.f32.mrf.mxu1 }
 0x20d   : > { %v523_v57 = vadd.f32 %v749_v55, %v522_v56 }
 0x20e   : > { %v875_v58 = vpop.f32.mrf.mxu1 }
 0x20f   : > { %v526_v59 = vmax.f32 %v523_v57, 0.0 }
 0x211   : > { %909 = vmatmul.mubr.f32.vlgmr.msra.gmra.mxu0 %v526_v59 }
 0x2d1   : > { %v616_v61 = vpop.f32.mrf.mxu0 }
 0x2d2   : > { %v617_v62 = vadd.f32 %v750_v60, %v616_v61 }
 0x2d3   : > { %v910_v63 = vpop.f32.mrf.mxu0 }
 0x2d4   : > { %620 = vst [vmem:[%s337_s18] sm:$0xff] %v617_v62 }
 0x2d5   : > { %1111 = shalt.err (!%p1108_p9)
}
 0x2d6   : > { %s1112_s9 = scalar_lea.hbm %s1437_s21, 128  ;;  %s1116_s10 = scalar_lea.hbm %s1481_s7, 256 }
 0x2d7   : > { %p1113_p13 = scmp.ne.s32.totalorder %s1437_s21, %s1112_s9  ;;  %p1117_p11 = scmp.lt.s32.totalorder %s1437_s21, %s1481_s7 }
 0x2d8   : > { %p1118_p1 = scmp.lt.s32.totalorder %s1116_s10, %s1112_s9 }
 0x2d9   : > { %p1114_p8 = pnand %p1113_p13, %p1503_p6 }
 0x2da   : > { %p1119_p2 = por %p1118_p1, %p1117_p11 }
 0x2db   : > { %p1115_p10 = pneg %p1114_p8 }
 0x2dd   : > { %p1120_p4 = pnand %p1119_p2, %p1115_p10 }
 0x2df   : > { %1123 = shalt.err (!%p1120_p4)
}
 0x2e0   : > { %925 = dma.vmem_to_hbm [thread:$0]  (%p1503_p6), %s636_s19, 128, %s1437_s21, %s622_s1  }
 0x2e1 PF: > { %s647_s22 = sand.u32 1, %s1158_s24   ;;  %p1504_p12 = scmp.ne.s32.totalorder %s1489_s8, 0 }
 0x2e2   : > { %p1505_p0 = scmp.ge.s32.totalorder %s1170_s27, 2  ;;  %s648_s18 = scalar_lea.sflag [#allocation4], %s647_s22 }
 0x2e4   : > { %p942_p5 = pnand %p1505_p0, %p1504_p12 }
 0x2e6   : > { %p943_p3 = pneg %p942_p5 }
 0x2e8   : > { %1153 = dma.done.wait (%p943_p3), %s648_s18, 128  }
 0x2e9   : > { %1155 = vsyncadd (%p943_p3), %s648_s18, 4294967168  ;;  %p22_p7 = scmp.ge.s32.totalorder %s1301_s14, 4   ;;  %s1506_s24 = smov %s1162_s25 }
 0x2ea   : > { %s1507_s25 = smov %s1166_s26  ;;  %s1508_s26 = smov %s1311_s17 }
 0x2eb   : > { %s1509_s27 = smov %s1301_s14  ;;  %24 = sbr.rel (!%p22_p7) target bundleno = 10 (0xa), region = 105 }
 0x2f0   :  { %653 = vsyncpa [#allocation3], 1 }
 0x2f1   :  { %655 = vsyncpa [#allocation3 + $0x1], 1 }
 0x2f2   :  { %656 = vsyncpa [#allocation6], 1 }
 0x2f3   :  { %657 = vsyncpa [#allocation9], 1 }
 0x2f4   :  { %658 = vsyncpa [#allocation4], 1 }
 0x2f5   :  { %660 = vsyncpa [#allocation4 + $0x1], 1 }

</bundles_post_ra>
